<compile_context>
chip_gen: v5e
topology: v5e:2x2
jax: 0.10.0
libtpu: 0.0.40
codegen_flags: <defaults>
</compile_context>

<pallas_src>
import functools

import jax
import jax.numpy as jnp
from jax.experimental import pallas as pl
from jax.experimental.pallas import tpu as pltpu

_LANE = 128      # lane width: hidden / output feature dims padded to this
_SUBLANE = 8     # f32 sublane: batch tiles are multiples of this


def _round_up(x, m):
    return ((x + m - 1) // m) * m


def _cdiv(a, b):
    return -(-a // b)


# ----------------------------------------------------------------------------
# Pallas kernel: full MLP for one batch tile.
# ----------------------------------------------------------------------------
def mo_ddqn_kernel(x_ref, w_in_ref, b_in_ref, w_hid_ref, b_hid_ref,
                   w_out_ref, b_out_ref, q_ref, *scratch, layer_n):
    cdt = w_in_ref.dtype          # bf16 MXU compute dtype; f32 accumulation
    out_dim = q_ref.shape[-1]     # real (unpadded) output width

    # Fused input projection (the PyTorch cat(state, pref) is done host-side),
    # then ReLU.  Activations are carried in bf16 between layers.
    h = jnp.dot(x_ref[...].astype(cdt), w_in_ref[...],
                preferred_element_type=jnp.float32)
    h = jnp.maximum(h + b_in_ref[...], 0.0).astype(cdt)

    if scratch:
        # Larger tiles: keep the activation in a bf16 VMEM scratch across the
        # statically unrolled layer loop (half the VMEM<->vreg traffic of f32).
        h_ref, = scratch
        h_ref[...] = h
        for i in range(layer_n):
            hi = jnp.dot(h_ref[...], w_hid_ref[i],
                         preferred_element_type=jnp.float32)
            h_ref[...] = jnp.maximum(hi + b_hid_ref[i], 0.0).astype(cdt)
        h = h_ref[...]
    else:
        # Small tiles (<=64 rows): carry h in vregs; avoids the per-layer
        # store+reload round-trip (v5e has a single vector-store slot).
        for i in range(layer_n):
            hi = jnp.dot(h, w_hid_ref[i], preferred_element_type=jnp.float32)
            h = jnp.maximum(hi + b_hid_ref[i], 0.0).astype(cdt)

    # Output projection (no activation).  The MXU runs lane-dense on the
    # 128-padded weight; only the real out_dim columns are stored.
    q = jnp.dot(h, w_out_ref[...], preferred_element_type=jnp.float32)
    q_ref[...] = (q + b_out_ref[...])[:, :out_dim]


# ----------------------------------------------------------------------------
# Parameter init (matches PyTorch: xavier_normal_ weights, zero biases).
# Weights are stored pre-transposed as (in_features, out_features).
# ----------------------------------------------------------------------------
def xavier_normal(key, fan_in, fan_out):
    std = jnp.sqrt(2.0 / (fan_in + fan_out))
    return std * jax.random.normal(key, (fan_in, fan_out), dtype=jnp.float32)


def init_params(key, state_size, reward_size, hidden_size, action_size,
                layer_n):
    in_dim = state_size + reward_size
    out_dim = action_size * reward_size
    keys = jax.random.split(key, 2 + layer_n)

    w_in = xavier_normal(keys[0], in_dim, hidden_size)
    b_in = jnp.zeros((1, hidden_size), jnp.float32)

    w_hid = jnp.stack(
        [xavier_normal(keys[1 + i], hidden_size, hidden_size)
         for i in range(layer_n)], axis=0)            # (layer_N, H, H)
    b_hid = jnp.zeros((layer_n, 1, hidden_size), jnp.float32)

    w_out = xavier_normal(keys[1 + layer_n], hidden_size, out_dim)
    b_out = jnp.zeros((1, out_dim), jnp.float32)

    return dict(w_in=w_in, b_in=b_in, w_hid=w_hid, b_hid=b_hid,
                w_out=w_out, b_out=b_out)


def prepare_params(params, *, weight_dtype=jnp.bfloat16):
    """One-time plumbing: pad feature dims to 128 lanes, cast weights to bf16
    (biases stay f32).  Zero-padding preserves the math exactly."""
    layer_n = params["w_hid"].shape[0]
    in_dim, hidden_size = params["w_in"].shape
    out_dim = params["w_out"].shape[1]
    hp = _round_up(hidden_size, _LANE)
    op = _round_up(out_dim, _LANE)

    def pad_to(a, shape):
        pads = [(0, t - s) for s, t in zip(a.shape, shape)]
        return jnp.pad(a, pads)

    return dict(
        w_in=pad_to(params["w_in"], (in_dim, hp)).astype(weight_dtype),
        b_in=pad_to(params["b_in"], (1, hp)).astype(jnp.float32),
        w_hid=pad_to(params["w_hid"], (layer_n, hp, hp)).astype(weight_dtype),
        b_hid=pad_to(params["b_hid"], (layer_n, 1, hp)).astype(jnp.float32),
        w_out=pad_to(params["w_out"], (hp, op)).astype(weight_dtype),
        b_out=pad_to(params["b_out"], (1, op)).astype(jnp.float32),
    )


# ----------------------------------------------------------------------------
# Helpers for specs / sizing
# ----------------------------------------------------------------------------
def _const_spec(block_shape):
    """Constant-index BlockSpec; single-buffered since the block never changes."""
    zeros = (0,) * len(block_shape)
    index_map = lambda i, _z=zeros: _z
    if hasattr(pl, "Buffered"):
        try:
            return pl.BlockSpec(block_shape, index_map,
                                pipeline_mode=pl.Buffered(1))
        except TypeError:
            pass
    return pl.BlockSpec(block_shape, index_map)


def _pick_batch_tile(B):
    bp8 = _round_up(max(B, 1), _SUBLANE)
    if bp8 <= _SUBLANE:
        return bp8
    # Target ~512-row tiles (amortizes per-step overhead) but always >=2 grid
    # steps so v7x's two TensorCores both get work; balance tiles across the
    # grid to minimise batch padding.
    steps = max(2, _cdiv(bp8, 512))
    return _round_up(_cdiv(bp8, steps), _SUBLANE)


def _vmem_cap_bytes():
    # ~48 MiB ceiling on v7x (64 MiB physical), ~100 MiB on v5e/v6e (128 MiB).
    try:
        phys = int(pltpu.get_tpu_info().vmem_capacity_bytes)
    except Exception:
        phys = 64 << 20
    return int(min(100 << 20, max(phys - (16 << 20), 32 << 20)))


# ----------------------------------------------------------------------------
# Wrapper
# ----------------------------------------------------------------------------
def mo_ddqn_forward(state, preference, padded, *, action_size, reward_size,
                    layer_n):
    """state: (B, state_size), preference: (B, reward_size) -> (B, A, R)."""
    B = state.shape[0]
    out_dim = action_size * reward_size
    if B == 0:
        return jnp.zeros((0, action_size, reward_size), jnp.float32)

    in_dim = state.shape[1] + preference.shape[1]
    hp, op = padded["w_out"].shape

    tb = _pick_batch_tile(B)
    bp = _round_up(B, tb)
    grid = (bp // tb,)

    # Fold the PyTorch concat into a single streamed input (K = in_dim dot).
    x = jnp.concatenate([state.astype(jnp.float32),
                         preference.astype(jnp.float32)], axis=1)
    x = jnp.pad(x, ((0, bp - B), (0, 0)))

    use_scratch = tb > 64
    scratch_shapes = ([pltpu.VMEM((tb, hp), jnp.bfloat16)]
                      if use_scratch else [])

    batch_map = lambda i: (i, 0)
    in_specs = [
        pl.BlockSpec((tb, in_dim), batch_map),        # x: streamed per tile
        _const_spec((in_dim, hp)),                    # weights: VMEM-resident,
        _const_spec((1, hp)),                         # single-buffered
        _const_spec((layer_n, hp, hp)),
        _const_spec((layer_n, 1, hp)),
        _const_spec((hp, op)),
        _const_spec((1, op)),
    ]
    # Only the real out_dim columns are written back (no padded-slab writeback).
    out_spec = pl.BlockSpec((tb, out_dim), batch_map)

    # Scheduling hints.
    flops = 2 * bp * (in_dim * hp + layer_n * hp * hp + hp * op)
    weight_bytes = sum(int(v.nbytes) for v in padded.values())
    bytes_accessed = int(x.nbytes) + weight_bytes + bp * out_dim * 4
    cost = pl.CostEstimate(flops=flops, transcendentals=0,
                           bytes_accessed=bytes_accessed)

    # VMEM budget: weights counted ONCE (Buffered(1)), activation tiles
    # double-buffered, bf16 h scratch, plus headroom for Mosaic internals.
    # TODO(synk): if layer_N*H*H weights ever exceed the cap below, switch
    # w_hid to memory_space=pl.ANY and stream one layer at a time.
    act_tile_bytes = tb * (in_dim + out_dim) * 4
    scratch_bytes = tb * hp * 2 if use_scratch else 0
    vmem_needed = weight_bytes + 2 * act_tile_bytes + scratch_bytes + (2 << 20)
    vmem_limit = int(min(max(vmem_needed, 8 << 20), _vmem_cap_bytes()))

    q_flat = pl.pallas_call(
        functools.partial(mo_ddqn_kernel, layer_n=layer_n),
        out_shape=jax.ShapeDtypeStruct((bp, out_dim), jnp.float32),
        grid_spec=pltpu.PrefetchScalarGridSpec(
            num_scalar_prefetch=0,
            grid=grid,
            in_specs=in_specs,
            out_specs=out_spec,
            scratch_shapes=scratch_shapes,
        ),
        compiler_params=pltpu.CompilerParams(
            dimension_semantics=("parallel",),
            vmem_limit_bytes=vmem_limit,
        ),
        cost_estimate=cost,
    )(x, padded["w_in"], padded["b_in"], padded["w_hid"], padded["b_hid"],
      padded["w_out"], padded["b_out"])

    return q_flat[:B].reshape(B, action_size, reward_size)


# ----------------------------------------------------------------------------
# Pure-JAX reference (f32, unpadded) for correctness check
# ----------------------------------------------------------------------------
def reference_forward(state, preference, params, *, action_size, reward_size,
                      layer_n):
    x = jnp.concatenate([state, preference], axis=1).astype(jnp.float32)
    h = jnp.maximum(x @ params["w_in"] + params["b_in"], 0.0)
    for i in range(layer_n):
        h = jnp.maximum(h @ params["w_hid"][i] + params["b_hid"][i], 0.0)
    q = h @ params["w_out"] + params["b_out"]
    return q.reshape(x.shape[0], action_size, reward_size)


def _run_case(key, batch, state_size, reward_size, action_size, hidden_size,
              layer_n):
    k_state, k_pref, k_params, k_b1, k_b2, k_b3 = jax.random.split(key, 6)
    state = jax.random.normal(k_state, (batch, state_size), dtype=jnp.float32)
    preference = jax.random.normal(k_pref, (batch, reward_size),
                                   dtype=jnp.float32)
    params = init_params(k_params, state_size, reward_size, hidden_size,
                         action_size, layer_n)
    # The module inits biases to 0; perturb them here so the bias path is
    # actually exercised by the check (forward semantics are parameter-agnostic).
    params["b_in"] = 0.1 * jax.random.normal(k_b1, params["b_in"].shape)
    params["b_hid"] = 0.1 * jax.random.normal(k_b2, params["b_hid"].shape)
    params["b_out"] = 0.1 * jax.random.normal(k_b3, params["b_out"].shape)

    padded = prepare_params(params, weight_dtype=jnp.bfloat16)
    q = mo_ddqn_forward(state, preference, padded,
                        action_size=action_size, reward_size=reward_size,
                        layer_n=layer_n)
    q = jax.block_until_ready(q)

    q_ref = reference_forward(state, preference, params,
                              action_size=action_size,
                              reward_size=reward_size, layer_n=layer_n)
    assert q.shape == (batch, action_size, reward_size)
    # Looser tolerance: weights/activations are bf16 (f32 accumulation).
    assert jnp.allclose(q, q_ref, atol=5e-2, rtol=5e-2), (
        float(jnp.max(jnp.abs(q - q_ref))))


if __name__ == "__main__":
    # Small shapes consistent with the module's forward.
    state_size = 6       # args.obs_shape
    reward_size = 3      # args.reward_size
    action_size = 4      # args.action_shape
    hidden_size = 32     # args.hidden_size
    layer_n = 2          # args.layer_N

    key = jax.random.PRNGKey(0)
    k1, k2 = jax.random.split(key)

    # Case 1: tiny batch -> single small tile, vreg-carried activations.
    _run_case(k1, 2, state_size, reward_size, action_size, hidden_size,
              layer_n)
    # Case 2: moderate batch -> 2 grid steps (v7x megacore path) + bf16 scratch.
    _run_case(k2, 192, state_size, reward_size, action_size, hidden_size,
              layer_n)

    print("KERNEL_OK")
</pallas_src>

<mosaic_0001>
module attributes {stable_mosaic.version = 11 : i64} {
  func.func @mo_ddqn_kernel(%arg0: i32, %arg1: memref<8x9xf32, #tpu.memory_space<vmem>>, %arg2: memref<9x128xbf16, #tpu.memory_space<vmem>>, %arg3: memref<1x128xf32, #tpu.memory_space<vmem>>, %arg4: memref<2x128x128xbf16, #tpu.memory_space<vmem>>, %arg5: memref<2x1x128xf32, #tpu.memory_space<vmem>>, %arg6: memref<128x128xbf16, #tpu.memory_space<vmem>>, %arg7: memref<1x128xf32, #tpu.memory_space<vmem>>, %arg8: memref<8x12xf32, #tpu.memory_space<vmem>>) attributes {dimension_semantics = [#tpu.dimension_semantics<parallel>], iteration_bounds = array<i64: 1>, scalar_prefetch = 0 : i64, scratch_operands = 0 : i64, tpu.core_type = #tpu.core_type<tc>, window_params = [{transform_indices = @transform_0, window_bounds = array<i64: 8, 9>}, {pipeline_mode = #tpu.pipeline_mode<synchronous>, transform_indices = @transform_1, window_bounds = array<i64: 9, 128>}, {pipeline_mode = #tpu.pipeline_mode<synchronous>, transform_indices = @transform_2, window_bounds = array<i64: 1, 128>}, {pipeline_mode = #tpu.pipeline_mode<synchronous>, transform_indices = @transform_3, window_bounds = array<i64: 2, 128, 128>}, {pipeline_mode = #tpu.pipeline_mode<synchronous>, transform_indices = @transform_4, window_bounds = array<i64: 2, 1, 128>}, {pipeline_mode = #tpu.pipeline_mode<synchronous>, transform_indices = @transform_5, window_bounds = array<i64: 128, 128>}, {pipeline_mode = #tpu.pipeline_mode<synchronous>, transform_indices = @transform_6, window_bounds = array<i64: 1, 128>}, {transform_indices = @transform_7, window_bounds = array<i64: 8, 12>}]} {
    %c0 = arith.constant 0 : index
    %c0_0 = arith.constant 0 : index
    %0 = vector.load %arg1[%c0, %c0_0] : memref<8x9xf32, #tpu.memory_space<vmem>>, vector<8x9xf32>
    %1 = arith.truncf %0 : vector<8x9xf32> to vector<8x9xbf16>
    %c0_1 = arith.constant 0 : index
    %c0_2 = arith.constant 0 : index
    %2 = vector.load %arg2[%c0_1, %c0_2] : memref<9x128xbf16, #tpu.memory_space<vmem>>, vector<9x128xbf16>
    %cst = arith.constant dense<0.000000e+00> : vector<8x128xf32>
    %3 = tpu.matmul %1, %2, %cst {dimension_numbers = #tpu.dot_dimension_numbers<[1], [0], [0], [1], [0, 0, 1, 1], [], []>} : vector<8x9xbf16>, vector<9x128xbf16>, vector<8x128xf32> -> vector<8x128xf32>
    %c0_3 = arith.constant 0 : index
    %c0_4 = arith.constant 0 : index
    %4 = vector.load %arg3[%c0_3, %c0_4] : memref<1x128xf32, #tpu.memory_space<vmem>>, vector<1x128xf32>
    %5 = vector.broadcast %4 : vector<1x128xf32> to vector<8x128xf32>
    %6 = arith.addf %3, %5 : vector<8x128xf32>
    %cst_5 = arith.constant 0.000000e+00 : f32
    %7 = vector.broadcast %cst_5 : f32 to vector<8x128xf32>
    %8 = arith.maximumf %6, %7 : vector<8x128xf32>
    %9 = arith.truncf %8 : vector<8x128xf32> to vector<8x128xbf16>
    %c0_6 = arith.constant 0 : index
    %c0_7 = arith.constant 0 : index
    %c0_8 = arith.constant 0 : index
    %10 = vector.load %arg4[%c0_6, %c0_7, %c0_8] : memref<2x128x128xbf16, #tpu.memory_space<vmem>>, vector<1x128x128xbf16>
    %11 = vector.shape_cast %10 : vector<1x128x128xbf16> to vector<128x128xbf16>
    %cst_9 = arith.constant dense<0.000000e+00> : vector<8x128xf32>
    %12 = tpu.matmul %9, %11, %cst_9 {dimension_numbers = #tpu.dot_dimension_numbers<[1], [0], [0], [1], [0, 0, 1, 1], [], []>} : vector<8x128xbf16>, vector<128x128xbf16>, vector<8x128xf32> -> vector<8x128xf32>
    %c0_10 = arith.constant 0 : index
    %c0_11 = arith.constant 0 : index
    %c0_12 = arith.constant 0 : index
    %13 = vector.load %arg5[%c0_10, %c0_11, %c0_12] : memref<2x1x128xf32, #tpu.memory_space<vmem>>, vector<1x1x128xf32>
    %14 = vector.shape_cast %13 : vector<1x1x128xf32> to vector<1x128xf32>
    %15 = vector.broadcast %14 : vector<1x128xf32> to vector<8x128xf32>
    %16 = arith.addf %12, %15 : vector<8x128xf32>
    %cst_13 = arith.constant 0.000000e+00 : f32
    %17 = vector.broadcast %cst_13 : f32 to vector<8x128xf32>
    %18 = arith.maximumf %16, %17 : vector<8x128xf32>
    %19 = arith.truncf %18 : vector<8x128xf32> to vector<8x128xbf16>
    %c1 = arith.constant 1 : index
    %c0_14 = arith.constant 0 : index
    %c0_15 = arith.constant 0 : index
    %20 = vector.load %arg4[%c1, %c0_14, %c0_15] : memref<2x128x128xbf16, #tpu.memory_space<vmem>>, vector<1x128x128xbf16>
    %21 = vector.shape_cast %20 : vector<1x128x128xbf16> to vector<128x128xbf16>
    %cst_16 = arith.constant dense<0.000000e+00> : vector<8x128xf32>
    %22 = tpu.matmul %19, %21, %cst_16 {dimension_numbers = #tpu.dot_dimension_numbers<[1], [0], [0], [1], [0, 0, 1, 1], [], []>} : vector<8x128xbf16>, vector<128x128xbf16>, vector<8x128xf32> -> vector<8x128xf32>
    %c1_17 = arith.constant 1 : index
    %c0_18 = arith.constant 0 : index
    %c0_19 = arith.constant 0 : index
    %23 = vector.load %arg5[%c1_17, %c0_18, %c0_19] : memref<2x1x128xf32, #tpu.memory_space<vmem>>, vector<1x1x128xf32>
    %24 = vector.shape_cast %23 : vector<1x1x128xf32> to vector<1x128xf32>
    %25 = vector.broadcast %24 : vector<1x128xf32> to vector<8x128xf32>
    %26 = arith.addf %22, %25 : vector<8x128xf32>
    %cst_20 = arith.constant 0.000000e+00 : f32
    %27 = vector.broadcast %cst_20 : f32 to vector<8x128xf32>
    %28 = arith.maximumf %26, %27 : vector<8x128xf32>
    %29 = arith.truncf %28 : vector<8x128xf32> to vector<8x128xbf16>
    %c0_21 = arith.constant 0 : index
    %c0_22 = arith.constant 0 : index
    %30 = vector.load %arg6[%c0_21, %c0_22] : memref<128x128xbf16, #tpu.memory_space<vmem>>, vector<128x128xbf16>
    %cst_23 = arith.constant dense<0.000000e+00> : vector<8x128xf32>
    %31 = tpu.matmul %29, %30, %cst_23 {dimension_numbers = #tpu.dot_dimension_numbers<[1], [0], [0], [1], [0, 0, 1, 1], [], []>} : vector<8x128xbf16>, vector<128x128xbf16>, vector<8x128xf32> -> vector<8x128xf32>
    %c0_24 = arith.constant 0 : index
    %c0_25 = arith.constant 0 : index
    %32 = vector.load %arg7[%c0_24, %c0_25] : memref<1x128xf32, #tpu.memory_space<vmem>>, vector<1x128xf32>
    %33 = vector.broadcast %32 : vector<1x128xf32> to vector<8x128xf32>
    %34 = arith.addf %31, %33 : vector<8x128xf32>
    %35 = vector.extract_strided_slice %34 {offsets = [0, 0], sizes = [8, 12], strides = [1, 1]} : vector<8x128xf32> to vector<8x12xf32>
    %c0_26 = arith.constant 0 : index
    %c0_27 = arith.constant 0 : index
    %36 = vector.load %arg8[%c0_26, %c0_27] : memref<8x12xf32, #tpu.memory_space<vmem>>, vector<8x12xf32>
    tpu.vector_store %arg8[%c0_26, %c0_27], %35 {strides = array<i32>} : memref<8x12xf32, #tpu.memory_space<vmem>>, vector<8x12xf32>,
    return
  }
  func.func @transform_0(%arg0: i32) -> (i32, i32) {
    %c0_i32 = arith.constant 0 : i32
    %c0_i32_0 = arith.constant 0 : i32
    return %arg0, %c0_i32 : i32, i32
  }
  func.func @transform_1(%arg0: i32) -> (i32, i32) {
    %c0_i32 = arith.constant 0 : i32
    %c0_i32_0 = arith.constant 0 : i32
    %c0_i32_1 = arith.constant 0 : i32
    return %c0_i32, %c0_i32_0 : i32, i32
  }
  func.func @transform_2(%arg0: i32) -> (i32, i32) {
    %c0_i32 = arith.constant 0 : i32
    %c0_i32_0 = arith.constant 0 : i32
    %c0_i32_1 = arith.constant 0 : i32
    return %c0_i32, %c0_i32_0 : i32, i32
  }
  func.func @transform_3(%arg0: i32) -> (i32, i32, i32) {
    %c0_i32 = arith.constant 0 : i32
    %c0_i32_0 = arith.constant 0 : i32
    %c0_i32_1 = arith.constant 0 : i32
    %c0_i32_2 = arith.constant 0 : i32
    return %c0_i32, %c0_i32_0, %c0_i32_1 : i32, i32, i32
  }
  func.func @transform_4(%arg0: i32) -> (i32, i32, i32) {
    %c0_i32 = arith.constant 0 : i32
    %c0_i32_0 = arith.constant 0 : i32
    %c0_i32_1 = arith.constant 0 : i32
    %c0_i32_2 = arith.constant 0 : i32
    return %c0_i32, %c0_i32_0, %c0_i32_1 : i32, i32, i32
  }
  func.func @transform_5(%arg0: i32) -> (i32, i32) {
    %c0_i32 = arith.constant 0 : i32
    %c0_i32_0 = arith.constant 0 : i32
    %c0_i32_1 = arith.constant 0 : i32
    return %c0_i32, %c0_i32_0 : i32, i32
  }
  func.func @transform_6(%arg0: i32) -> (i32, i32) {
    %c0_i32 = arith.constant 0 : i32
    %c0_i32_0 = arith.constant 0 : i32
    %c0_i32_1 = arith.constant 0 : i32
    return %c0_i32, %c0_i32_0 : i32, i32
  }
  func.func @transform_7(%arg0: i32) -> (i32, i32) {
    %c0_i32 = arith.constant 0 : i32
    %c0_i32_0 = arith.constant 0 : i32
    return %arg0, %c0_i32 : i32, i32
  }
}

</mosaic_0001>

<bundles_post_ra>
// kernel: tpu_custom_call.1
= control target key start
LH: loop header
LB: loop body
LE: loop exit
PB: predicated region body
PF: predicated region fallthrough
CT: control target
= control target key end

     0   :  { %12 = vsyncpa [#allocation3], 0  ;;  %s740_s0 = inlined_call_operand.hbm [shape: f32[8,9], index: 0, kind: input, shape index: {}]   ;;  %s741_s1 = inlined_call_operand.hbm [shape: bf16[9,128], index: 1, kind: input, shape index: {}]   ;;  %s742_s2 = inlined_call_operand.vmem [shape: f32[1,128], index: 2, kind: input, shape index: {}]   ;;  %s743_s3 = inlined_call_operand.hbm [shape: bf16[2,128,128], index: 3, kind: input, shape index: {}]   ;;  %s744_s4 = inlined_call_operand.vmem [shape: f32[2,1,128], index: 4, kind: input, shape index: {}]   ;;  %s745_s5 = inlined_call_operand.hbm [shape: bf16[128,128], index: 5, kind: input, shape index: {}]   ;;  %s746_s6 = inlined_call_operand.vmem [shape: f32[1,128], index: 6, kind: input, shape index: {}]   ;;  %s747_s7 = inlined_call_operand.hbm [shape: f32[8,12], index: 7, kind: output, shape index: {}]  }
   0x1   :  { %13 = vsyncpa [#allocation6], 0 }
   0x2   :  { %14 = vsyncpa [#allocation9], 0  ;;  %s31_s26 = sshll.u32 %s741_s1, 4  ;;  %s32_s26 = int_to_ptr.hbm [resolvable:$true] %s31_s26 }
   0x3   :  { %15 = vsyncpa [#allocation4], 0  ;;  %s665_s27 = smov [#allocation5]   ;;  %s21_s8 = sshll.u32 %s740_s0, 4  ;;  %s22_s8 = int_to_ptr.hbm [resolvable:$true] %s21_s8 }
   0x4   :  { %s33_s28 = sshll.u32 %s665_s27, 4  ;;  %s666_s9 = smov 64   ;;  %s34_s28 = int_to_ptr.vmem [resolvable:$true] %s33_s28 }
   0x5   :  { %s667_s10 = smov 4   ;;  %s668_s11 = smov [#allocation2]  }
   0x6   :  { %39 = dma.hbm_to_vmem [thread:$0]  %s32_s26, 128, %s34_s28, [#allocation6], %s666_s9, %s666_s9, %s667_s10  }
   0x7   :  { %s23_s12 = sshll.u32 %s668_s11, 4  ;;  %s46_s15 = sshll.u32 %s743_s3, 4  ;;  %s24_s12 = int_to_ptr.vmem [resolvable:$true] %s23_s12  ;;  %s47_s15 = int_to_ptr.hbm [resolvable:$true] %s46_s15 }
   0x8   :  { %26 = dma.hbm_to_vmem [thread:$0]  %s22_s8, 128, %s24_s12, [#allocation3]  }
   0x9   :  { %s61_s17 = sshll.u32 %s745_s5, 4  ;;  %s669_s18 = smov [#allocation7]   ;;  %s62_s17 = int_to_ptr.hbm [resolvable:$true] %s61_s17 }
   0xa   :  { %s48_s19 = sshll.u32 %s669_s18, 4  ;;  %s670_s0 = smov [#allocation8]   ;;  %s49_s19 = int_to_ptr.vmem [resolvable:$true] %s48_s19 }
   0xb   :  { %54 = dma.hbm_to_vmem [thread:$0]  %s47_s15, 2048, %s49_s19, [#allocation6], %s666_s9, %s666_s9, %s667_s10  }
   0xc   :  { %s63_s20 = sshll.u32 %s670_s0, 4  ;;  %s64_s20 = int_to_ptr.vmem [resolvable:$true] %s63_s20 }
   0xd   :  { %69 = dma.hbm_to_vmem [thread:$0]  %s62_s17, 1024, %s64_s20, [#allocation9], %s666_s9, %s666_s9, %s667_s10  }
   0xe   :  { %657 = dma.done.wait [#allocation3], 128  }
   0xf   :  { %658 = vsyncadd [#allocation3], 4294967168 }
  0x10   :  { %659 = dma.done.wait [#allocation6], 2176  }
  0x11   :  { %660 = vsyncadd [#allocation6], 4294965120 }
  0x12   :  { %661 = dma.done.wait [#allocation9], 1024  }
  0x13   :  { %662 = vsyncadd [#allocation9], 4294966272  ;;  %vm106_vm0 = vcmask 1043456   ;;  %vm107_vm1 = vcmask 1044480   ;;  %v671_v0 = vmov 65535   ;;  %v89_v6 = vld [vmem:[#allocation2] sm:$0xff] }
  0x14   :  { %v108_v1 = vsel %vm106_vm0, 4294967295, %v671_v0  ;;  %v400_v2 = vld [vmem:[#allocation5] sm:$0xf]  ;;  %v500_v3 = vld [vmem:[#allocation5] sm:$0x10]  ;;  %v507_v9 = vld [vmem:[#allocation7 + $0x30] sm:$0xff]  ;;  %v90_v10 = vpack.c.bf16 %v89_v6, %v89_v6 }
  0x15   :  { %v109_v4 = vsel %vm107_vm1, %v108_v1, 0  ;;  %v401_v5 = vor.u32 %v500_v3, %v400_v2  ;;  %v508_v7 = vld [vmem:[#allocation7 + $0x38] sm:$0xff]  ;;  %vm102_vm2 = vcmask 72704   ;;  %v506_v11 = vld [vmem:[#allocation7 + $0x28] sm:$0xff]  ;;  %v505_v12 = vld [vmem:[#allocation7 + $0x20] sm:$0xff]  ;;  %s672_s26 = smov [#allocation10]  }
  0x16   :  { %196 = vmatpush.bf16.msra.mxu1 %v508_v7  ;;  %v504_v13 = vld [vmem:[#allocation7 + $0x18] sm:$0xff]  ;;  %v503_v14 = vld [vmem:[#allocation7 + $0x10] sm:$0xff]  ;;  %v502_v15 = vld [vmem:[#allocation7 + $0x8] sm:$0xff]  ;;  %s384_s27 = sshll.u32 %s672_s26, 4  ;;  %s386_s30 = sshll.u32 %s747_s7, 4  ;;  %vm377_vm3 = vcmask 97280   ;;  %s385_s27 = int_to_ptr.vmem [resolvable:$true] %s384_s27  ;;  %s387_s30 = int_to_ptr.hbm [resolvable:$true] %s386_s30 }
  0x17   :  { %v111_v8 = vand.u32 %v401_v5, %v109_v4  ;;  %v501_v16 = vld [vmem:[#allocation7] sm:$0xff]  ;;  %v516_v17 = vld [vmem:[#allocation7 + $0x78] sm:$0xff]  ;;  %v515_v18 = vld [vmem:[#allocation7 + $0x70] sm:$0xff] }
  0x18   :  { %281 = vmatpush.bf16.msra.mxu2 %v516_v17  ;;  %v514_v19 = vld [vmem:[#allocation7 + $0x68] sm:$0xff]  ;;  %v513_v20 = vld [vmem:[#allocation7 + $0x60] sm:$0xff]  ;;  %v512_v21 = vld [vmem:[#allocation7 + $0x58] sm:$0xff] }
  0x19   :  { %120 = vmatpush.bf16.msra.mxu0 %v111_v8  ;;  %v511_v22 = vld [vmem:[#allocation7 + $0x50] sm:$0xff]  ;;  %v510_v29 = vld [vmem:[#allocation7 + $0x48] sm:$0xff]  ;;  %v509_v30 = vld [vmem:[#allocation7 + $0x40] sm:$0xff] }
  0x1a   :  { %197 = vmatpush.bf16.msra.mxu1 %v507_v9  ;;  %v533_v23 = vld [vmem:[%s742_s2] ss:$0 sm:$0xff]  ;;  %v524_v31 = vld [vmem:[#allocation8 + $0x38] sm:$0xff]  ;;  %v522_v33 = vld [vmem:[#allocation8 + $0x28] sm:$0xff] }
  0x1b   :  { %364 = vmatpush.bf16.msra.mxu3 %v524_v31  ;;  %v523_v32 = vld [vmem:[#allocation8 + $0x30] sm:$0xff]  ;;  %v521_v34 = vld [vmem:[#allocation8 + $0x20] sm:$0xff]  ;;  %v520_v35 = vld [vmem:[#allocation8 + $0x18] sm:$0xff] }
  0x1c   :  { %402 = vmatmul.msk.bf16.vlgmr.msra.gmra.mxu0 %vm102_vm2, %v90_v10  ;;  %282 = vmatpush.bf16.msra.mxu2 %v515_v18  ;;  %v519_v36 = vld [vmem:[#allocation8 + $0x10] sm:$0xff]  ;;  %v518_v43 = vld [vmem:[#allocation8 + $0x8] sm:$0xff]  ;;  %v517_v44 = vld [vmem:[#allocation8] sm:$0xff] }
  0x1d   :  { %v534_v37 = vld [vmem:[%s744_s4] ss:$0 sm:$0xff]  ;;  %v535_v45 = vld [vmem:[%s744_s4 + $0x1] ss:$0 sm:$0xff] }
  0x1e   :  { %198 = vmatpush.bf16.msra.mxu1 %v506_v11  ;;  %v536_v51 = vld [vmem:[%s746_s6] ss:$0 sm:$0xff] }
  0x1f   :  { %365 = vmatpush.bf16.msra.mxu3 %v523_v32 }
  0x20   :  { %283 = vmatpush.bf16.msra.mxu2 %v514_v19 }
  0x22   :  { %199 = vmatpush.bf16.msra.mxu1 %v505_v12 }
  0x23   :  { %366 = vmatpush.bf16.msra.mxu3 %v522_v33 }
  0x24   :  { %284 = vmatpush.bf16.msra.mxu2 %v513_v20 }
  0x26   :  { %200 = vmatpush.bf16.msra.mxu1 %v504_v13 }
  0x27   :  { %367 = vmatpush.bf16.msra.mxu3 %v521_v34 }
  0x28   :  { %285 = vmatpush.bf16.msra.mxu2 %v512_v21 }
  0x2a   :  { %201 = vmatpush.bf16.msra.mxu1 %v503_v14 }
  0x2b   :  { %368 = vmatpush.bf16.msra.mxu3 %v520_v35 }
  0x2c   :  { %286 = vmatpush.bf16.msra.mxu2 %v511_v22 }
  0x2e   :  { %202 = vmatpush.bf16.msra.mxu1 %v502_v15 }
  0x2f   :  { %369 = vmatpush.bf16.msra.mxu3 %v519_v36 }
  0x30   :  { %287 = vmatpush.bf16.msra.mxu2 %v510_v29 }
  0x32   :  { %203 = vmatpush.bf16.msra.mxu1 %v501_v16 }
  0x33   :  { %370 = vmatpush.bf16.msra.mxu3 %v518_v43 }
  0x34   :  { %288 = vmatpush.bf16.msra.mxu2 %v509_v30 }
  0x37   :  { %371 = vmatpush.bf16.msra.mxu3 %v517_v44 }
  0x99   :  { %v122_v24 = vpop.f32.mrf.mxu0 }
  0x9a   :  { %v123_v25 = vadd.f32 %v533_v23, %v122_v24 }
  0x9c   :  { %v126_v26 = vmax.f32 %v123_v25, 0.0 }
  0x9e   :  { %v127_v27 = vpack.c.bf16 %v126_v26, %v126_v26 }
  0xa0   :  { %204 = vmatmul.bf16.vlgmr.msra.gmra.mxu1 %v127_v27 }
  0xa1   :  { %v124_v28 = vpop.f32.mrf.mxu0 }
 0x11d   :  { %v205_v38 = vpop.f32.mrf.mxu1 }
 0x11e   :  { %v206_v39 = vadd.f32 %v534_v37, %v205_v38 }
 0x120   :  { %v209_v40 = vmax.f32 %v206_v39, 0.0 }
 0x122   :  { %v210_v41 = vpack.c.bf16 %v209_v40, %v209_v40 }
 0x124   :  { %289 = vmatmul.bf16.vlgmr.msra.gmra.mxu2 %v210_v41 }
 0x125   :  { %v207_v42 = vpop.f32.mrf.mxu1 }
 0x1a7   :  { %v290_v46 = vpop.f32.mrf.mxu2 }
 0x1a8   :  { %v291_v47 = vadd.f32 %v535_v45, %v290_v46 }
 0x1aa   :  { %v294_v48 = vmax.f32 %v291_v47, 0.0 }
 0x1ac   :  { %v295_v49 = vpack.c.bf16 %v294_v48, %v294_v48 }
 0x1ae   :  { %372 = vmatmul.bf16.vlgmr.msra.gmra.mxu3 %v295_v49 }
 0x1af   :  { %v292_v50 = vpop.f32.mrf.mxu2 }
 0x231   :  { %v373_v52 = vpop.f32.mrf.mxu3 }
 0x232   :  { %v374_v53 = vadd.f32 %v536_v51, %v373_v52 }
 0x234   :  { %378 = vst.msk [vmem:[#allocation10] sm:$0xff] %vm377_vm3, %v374_v53 }
 0x235   :  { %389 = dma.vmem_to_hbm [thread:$0]  %s385_s27, 128, %s387_s30, [#allocation4]  }
 0x239   :  { %v375_v54 = vpop.f32.mrf.mxu3 }
 0x23a   :  { %663 = dma.done.wait [#allocation4], 128  }
 0x23b   :  { %664 = vsyncadd [#allocation4], 4294967168 }
 0x23c   :  { %394 = vsyncpa [#allocation3], 1 }
 0x23d   :  { %395 = vsyncpa [#allocation6], 1 }
 0x23e   :  { %396 = vsyncpa [#allocation9], 1 }
 0x23f   :  { %397 = vsyncpa [#allocation4], 1 }

</bundles_post_ra>
